<compile_context>
chip_gen: v7x
topology: tpu7x:2x2x1
jax: 0.10.0
libtpu: 0.0.40
codegen_flags: <defaults>
</compile_context>

<pallas_src>
import math

import jax
import jax.numpy as jnp
from jax.experimental import pallas as pl
from jax.experimental.pallas import tpu as pltpu

LANE = 128            # TPU lane width: hidden dims padded to this
DEFAULT_TILE_B = 2048  # batch tile (rows per grid step)


def _round_up(x, m):
    return ((x + m - 1) // m) * m


def _mlp_critic_kernel(x_ref, w1_ref, b1_ref, w2_ref, b2_ref, w3_ref, b3_ref,
                       out_ref):
    # x: (TB, obs_dim) f32, streamed unpadded from HBM (lane-masked load).
    x = x_ref[...].astype(jnp.bfloat16)  # cast for MXU; VPU work, essentially free
    # Hidden layer 1: Linear (MXU, f32 accumulation) + Tanh (f32, EUP).
    h = jnp.dot(x, w1_ref[...], preferred_element_type=jnp.float32)
    h = jnp.tanh(h + b1_ref[...])
    # Hidden layer 2: Linear + Tanh.
    h = jnp.dot(h.astype(jnp.bfloat16), w2_ref[...],
                preferred_element_type=jnp.float32)
    h = jnp.tanh(h + b2_ref[...])
    # Output layer (hidden -> 1): VPU multiply + lane reduce (XLU) instead of
    # an N=1 MXU matmul.  Padded w3 lanes are zero, so the 128-lane reduce is
    # exact.
    v = jnp.sum(h * w3_ref[...], axis=-1, keepdims=True) + b3_ref[...]
    # (TB, 1) store: ~4 B/row, negligible next to the 64 B/row obs stream.
    out_ref[...] = v.astype(out_ref.dtype)


def prepare_params(params):
    """Pad hidden dims to lane width and cast MXU operands to bf16 (once)."""
    w1, b1 = params["w1"], params["b1"]
    w2, b2 = params["w2"], params["b2"]
    w3, b3 = params["w3"], params["b3"]
    obs_dim, h1 = w1.shape
    h2 = w2.shape[1]
    assert w3.shape[1] == 1, "d_output must be 1 for squeeze(-1) semantics"

    h1_pad = _round_up(h1, LANE)
    h2_pad = _round_up(h2, LANE)

    # Note: obs_dim (the contraction dim of layer 1) is NOT padded; the obs
    # stream stays at its native width.
    w1p = jnp.zeros((obs_dim, h1_pad), jnp.float32).at[:, :h1].set(w1)
    b1p = jnp.zeros((1, h1_pad), jnp.float32).at[:, :h1].set(b1)
    w2p = jnp.zeros((h1_pad, h2_pad), jnp.float32).at[:h1, :h2].set(w2)
    b2p = jnp.zeros((1, h2_pad), jnp.float32).at[:, :h2].set(b2)
    # Final layer stored as a lane-dense (1, hidden_pad) row for the VPU path.
    w3p = jnp.zeros((1, h2_pad), jnp.float32).at[:, :h2].set(w3[:, 0][None, :])
    b3p = b3.reshape(1, 1).astype(jnp.float32)

    return {
        "w1": w1p.astype(jnp.bfloat16),   # MXU operand -> bf16
        "b1": b1p,                        # f32 bias / tanh path
        "w2": w2p.astype(jnp.bfloat16),   # MXU operand -> bf16
        "b2": b2p,
        "w3": w3p,                        # f32: VPU/XLU path, not MXU
        "b3": b3p,
        "obs_dim": obs_dim,
    }


def mlp_d_critic_forward(obs, prepared, *, tile_b=DEFAULT_TILE_B):
    """obs: (B, obs_dim) float32. prepared: output of prepare_params.

    Returns: (B,) float32, matching torch.squeeze(self.v_net(obs), -1).
    """
    B, obs_dim = obs.shape
    assert obs_dim == prepared["obs_dim"]

    w1, b1 = prepared["w1"], prepared["b1"]
    w2, b2 = prepared["w2"], prepared["b2"]
    w3, b3 = prepared["w3"], prepared["b3"]

    # Batch tile: multiple of 8 (sublanes), capped at tile_b.  No host-side
    # batch padding: the boundary block is padded on read and out-of-bounds
    # output rows are dropped by Pallas.
    tb = min(tile_b, _round_up(B, 8))
    grid = (pl.cdiv(B, tb),)

    out = pl.pallas_call(
        _mlp_critic_kernel,
        out_shape=jax.ShapeDtypeStruct((B, 1), jnp.float32),
        grid=grid,
        in_specs=[
            # obs: tiled along batch, pipelined; native width (last dim = full
            # array dim), native f32.
            pl.BlockSpec((tb, obs_dim), lambda i: (i, 0)),
            # weights/biases: constant block index -> resident across steps.
            pl.BlockSpec(w1.shape, lambda i: (0, 0)),
            pl.BlockSpec(b1.shape, lambda i: (0, 0)),
            pl.BlockSpec(w2.shape, lambda i: (0, 0)),
            pl.BlockSpec(b2.shape, lambda i: (0, 0)),
            pl.BlockSpec(w3.shape, lambda i: (0, 0)),
            pl.BlockSpec(b3.shape, lambda i: (0, 0)),
        ],
        out_specs=pl.BlockSpec((tb, 1), lambda i: (i, 0)),
        compiler_params=pltpu.CompilerParams(
            dimension_semantics=("parallel",)),
    )(obs.astype(jnp.float32), w1, b1, w2, b2, w3, b3)

    # squeeze(-1): glue, done outside the kernel.
    return out[:, 0]


def init_params(key, obs_dim, hidden_sizes, d_output):
    """Deterministic init mimicking nn.Linear default (uniform +/- 1/sqrt(fan_in))."""
    sizes = [obs_dim] + list(hidden_sizes) + [d_output]
    params = {}
    keys = jax.random.split(key, 2 * (len(sizes) - 1))
    for j in range(len(sizes) - 1):
        fan_in, fan_out = sizes[j], sizes[j + 1]
        bound = 1.0 / math.sqrt(fan_in)
        w = jax.random.uniform(keys[2 * j], (fan_in, fan_out),
                               minval=-bound, maxval=bound, dtype=jnp.float32)
        b = jax.random.uniform(keys[2 * j + 1], (1, fan_out),
                               minval=-bound, maxval=bound, dtype=jnp.float32)
        params[f"w{j + 1}"] = w
        params[f"b{j + 1}"] = b
    return params


if __name__ == "__main__":
    # Small shapes consistent with the module: obs_dim=16, two hidden layers
    # of 32 with Tanh activation, d_output=1, batch=8.  (At this size the call
    # is launch-overhead dominated; the tiling / bf16-MXU / lane-padding wins
    # only materialize at realistic RL batch sizes in the thousands.)
    obs_dim = 16
    hidden_sizes = (32, 32)
    d_output = 1
    batch = 8

    key = jax.random.PRNGKey(0)
    k_obs, k_params = jax.random.split(key)

    obs = jax.random.normal(k_obs, (batch, obs_dim), dtype=jnp.float32)
    params = init_params(k_params, obs_dim, hidden_sizes, d_output)
    prepared = prepare_params(params)

    v = mlp_d_critic_forward(obs, prepared)
    v = jax.block_until_ready(v)

    # Pure-JAX reference in the same mixed precision (bf16 inputs to the two
    # hidden matmuls, f32 accumulation / bias / tanh; exact-f32 final layer).
    obs_b = obs.astype(jnp.bfloat16)
    h = jnp.dot(obs_b, params["w1"].astype(jnp.bfloat16),
                preferred_element_type=jnp.float32) + params["b1"]
    h = jnp.tanh(h)
    h = jnp.dot(h.astype(jnp.bfloat16), params["w2"].astype(jnp.bfloat16),
                preferred_element_type=jnp.float32) + params["b2"]
    h = jnp.tanh(h)
    ref = jnp.sum(h * params["w3"][:, 0][None, :], axis=-1) + params["b3"][0, 0]

    assert v.shape == (batch,), v.shape
    assert jnp.allclose(v, ref, atol=1e-4, rtol=1e-4), (v, ref)

    print("KERNEL_OK")
</pallas_src>

<mosaic_0001>
module attributes {stable_mosaic.version = 11 : i64} {
  func.func @_mlp_critic_kernel(%arg0: i32, %arg1: memref<8x16xf32, #tpu.memory_space<vmem>>, %arg2: memref<16x128xbf16, #tpu.memory_space<vmem>>, %arg3: memref<1x128xf32, #tpu.memory_space<vmem>>, %arg4: memref<128x128xbf16, #tpu.memory_space<vmem>>, %arg5: memref<1x128xf32, #tpu.memory_space<vmem>>, %arg6: memref<1x128xf32, #tpu.memory_space<vmem>>, %arg7: memref<1x1xf32, #tpu.memory_space<vmem>>, %arg8: memref<8x1xf32, #tpu.memory_space<vmem>>) attributes {dimension_semantics = [#tpu.dimension_semantics<parallel>], iteration_bounds = array<i64: 1>, scalar_prefetch = 0 : i64, scratch_operands = 0 : i64, tpu.core_type = #tpu.core_type<tc>, window_params = [{transform_indices = @transform_0, window_bounds = array<i64: 8, 16>}, {pipeline_mode = #tpu.pipeline_mode<synchronous>, transform_indices = @transform_1, window_bounds = array<i64: 16, 128>}, {pipeline_mode = #tpu.pipeline_mode<synchronous>, transform_indices = @transform_2, window_bounds = array<i64: 1, 128>}, {pipeline_mode = #tpu.pipeline_mode<synchronous>, transform_indices = @transform_3, window_bounds = array<i64: 128, 128>}, {pipeline_mode = #tpu.pipeline_mode<synchronous>, transform_indices = @transform_4, window_bounds = array<i64: 1, 128>}, {pipeline_mode = #tpu.pipeline_mode<synchronous>, transform_indices = @transform_5, window_bounds = array<i64: 1, 128>}, {pipeline_mode = #tpu.pipeline_mode<synchronous>, transform_indices = @transform_6, window_bounds = array<i64: 1, 1>}, {transform_indices = @transform_7, window_bounds = array<i64: 8, 1>}]} {
    %c0 = arith.constant 0 : index
    %c0_0 = arith.constant 0 : index
    %0 = vector.load %arg1[%c0, %c0_0] : memref<8x16xf32, #tpu.memory_space<vmem>>, vector<8x16xf32>
    %1 = arith.truncf %0 : vector<8x16xf32> to vector<8x16xbf16>
    %c0_1 = arith.constant 0 : index
    %c0_2 = arith.constant 0 : index
    %2 = vector.load %arg2[%c0_1, %c0_2] : memref<16x128xbf16, #tpu.memory_space<vmem>>, vector<16x128xbf16>
    %cst = arith.constant dense<0.000000e+00> : vector<8x128xf32>
    %3 = tpu.matmul %1, %2, %cst {dimension_numbers = #tpu.dot_dimension_numbers<[1], [0], [0], [1], [0, 0, 1, 1], [], []>} : vector<8x16xbf16>, vector<16x128xbf16>, vector<8x128xf32> -> vector<8x128xf32>
    %c0_3 = arith.constant 0 : index
    %c0_4 = arith.constant 0 : index
    %4 = vector.load %arg3[%c0_3, %c0_4] : memref<1x128xf32, #tpu.memory_space<vmem>>, vector<1x128xf32>
    %5 = vector.broadcast %4 : vector<1x128xf32> to vector<8x128xf32>
    %6 = arith.addf %3, %5 : vector<8x128xf32>
    %7 = math.tanh %6 : vector<8x128xf32>
    %8 = arith.truncf %7 : vector<8x128xf32> to vector<8x128xbf16>
    %c0_5 = arith.constant 0 : index
    %c0_6 = arith.constant 0 : index
    %9 = vector.load %arg4[%c0_5, %c0_6] : memref<128x128xbf16, #tpu.memory_space<vmem>>, vector<128x128xbf16>
    %cst_7 = arith.constant dense<0.000000e+00> : vector<8x128xf32>
    %10 = tpu.matmul %8, %9, %cst_7 {dimension_numbers = #tpu.dot_dimension_numbers<[1], [0], [0], [1], [0, 0, 1, 1], [], []>} : vector<8x128xbf16>, vector<128x128xbf16>, vector<8x128xf32> -> vector<8x128xf32>
    %c0_8 = arith.constant 0 : index
    %c0_9 = arith.constant 0 : index
    %11 = vector.load %arg5[%c0_8, %c0_9] : memref<1x128xf32, #tpu.memory_space<vmem>>, vector<1x128xf32>
    %12 = vector.broadcast %11 : vector<1x128xf32> to vector<8x128xf32>
    %13 = arith.addf %10, %12 : vector<8x128xf32>
    %14 = math.tanh %13 : vector<8x128xf32>
    %c0_10 = arith.constant 0 : index
    %c0_11 = arith.constant 0 : index
    %15 = vector.load %arg6[%c0_10, %c0_11] : memref<1x128xf32, #tpu.memory_space<vmem>>, vector<1x128xf32>
    %16 = vector.broadcast %15 : vector<1x128xf32> to vector<8x128xf32>
    %17 = arith.mulf %14, %16 : vector<8x128xf32>
    %cst_12 = arith.constant dense<0.000000e+00> : vector<8xf32>
    %18 = vector.multi_reduction <add>, %17, %cst_12 [1] : vector<8x128xf32> to vector<8xf32>
    %19 = vector.shape_cast %18 : vector<8xf32> to vector<8x1xf32>
    %c0_13 = arith.constant 0 : index
    %c0_14 = arith.constant 0 : index
    %20 = vector.load %arg7[%c0_13, %c0_14] : memref<1x1xf32, #tpu.memory_space<vmem>>, vector<1x1xf32>
    %21 = vector.broadcast %20 : vector<1x1xf32> to vector<8x1xf32>
    %22 = arith.addf %19, %21 : vector<8x1xf32>
    %c0_15 = arith.constant 0 : index
    %c0_16 = arith.constant 0 : index
    %23 = vector.load %arg8[%c0_15, %c0_16] : memref<8x1xf32, #tpu.memory_space<vmem>>, vector<8x1xf32>
    tpu.vector_store %arg8[%c0_15, %c0_16], %22 {strides = array<i32>} : memref<8x1xf32, #tpu.memory_space<vmem>>, vector<8x1xf32>,
    return
  }
  func.func @transform_0(%arg0: i32) -> (i32, i32) {
    %c0_i32 = arith.constant 0 : i32
    %c0_i32_0 = arith.constant 0 : i32
    return %arg0, %c0_i32 : i32, i32
  }
  func.func @transform_1(%arg0: i32) -> (i32, i32) {
    %c0_i32 = arith.constant 0 : i32
    %c0_i32_0 = arith.constant 0 : i32
    %c0_i32_1 = arith.constant 0 : i32
    return %c0_i32, %c0_i32_0 : i32, i32
  }
  func.func @transform_2(%arg0: i32) -> (i32, i32) {
    %c0_i32 = arith.constant 0 : i32
    %c0_i32_0 = arith.constant 0 : i32
    %c0_i32_1 = arith.constant 0 : i32
    return %c0_i32, %c0_i32_0 : i32, i32
  }
  func.func @transform_3(%arg0: i32) -> (i32, i32) {
    %c0_i32 = arith.constant 0 : i32
    %c0_i32_0 = arith.constant 0 : i32
    %c0_i32_1 = arith.constant 0 : i32
    return %c0_i32, %c0_i32_0 : i32, i32
  }
  func.func @transform_4(%arg0: i32) -> (i32, i32) {
    %c0_i32 = arith.constant 0 : i32
    %c0_i32_0 = arith.constant 0 : i32
    %c0_i32_1 = arith.constant 0 : i32
    return %c0_i32, %c0_i32_0 : i32, i32
  }
  func.func @transform_5(%arg0: i32) -> (i32, i32) {
    %c0_i32 = arith.constant 0 : i32
    %c0_i32_0 = arith.constant 0 : i32
    %c0_i32_1 = arith.constant 0 : i32
    return %c0_i32, %c0_i32_0 : i32, i32
  }
  func.func @transform_6(%arg0: i32) -> (i32, i32) {
    %c0_i32 = arith.constant 0 : i32
    %c0_i32_0 = arith.constant 0 : i32
    %c0_i32_1 = arith.constant 0 : i32
    return %c0_i32, %c0_i32_0 : i32, i32
  }
  func.func @transform_7(%arg0: i32) -> (i32, i32) {
    %c0_i32 = arith.constant 0 : i32
    %c0_i32_0 = arith.constant 0 : i32
    return %arg0, %c0_i32 : i32, i32
  }
}

</mosaic_0001>

<bundles_post_ra>
// kernel: tpu_custom_call.1
= control target key start
LH: loop header
LB: loop body
LE: loop exit
PB: predicated region body
PF: predicated region fallthrough
CT: control target
= control target key end

     0   :  { %s514_s0 = inlined_call_operand.hbm [shape: f32[8,16], index: 0, kind: input, shape index: {}]   ;;  %s515_s1 = inlined_call_operand.hbm [shape: bf16[16,128], index: 1, kind: input, shape index: {}]   ;;  %s516_s2 = inlined_call_operand.vmem [shape: f32[1,128], index: 2, kind: input, shape index: {}]   ;;  %s517_s3 = inlined_call_operand.hbm [shape: bf16[128,128], index: 3, kind: input, shape index: {}]   ;;  %s518_s4 = inlined_call_operand.vmem [shape: f32[1,128], index: 4, kind: input, shape index: {}]   ;;  %s519_s5 = inlined_call_operand.vmem [shape: f32[1,128], index: 5, kind: input, shape index: {}]   ;;  %s520_s6 = inlined_call_operand.<no memory space> [shape: f32[1,1], index: 6, kind: input, shape index: {}]   ;;  %s521_s7 = inlined_call_operand.vmem [shape: f32[8,1], index: 7, kind: output, shape index: {}]  }
   0x1   :  { %v12_v0 = vstv %s520_s6 }
   0x2   :  { %13 = vst [vmem:[#allocation2] sm:$0x1] %v12_v0 }
   0x3   :  { %14 = vsyncpa [#allocation4], 0 }
   0x4   :  { %15 = vsyncpa [#allocation6], 0  ;;  %s410_s26 = smov [#allocation5]   ;;  %s340_s30 = scalar_lea.hbm %s515_s1, 128 }
   0x5   :  { %s31_s27 = sshll.u32 %s410_s26, 4  ;;  %p341_p0 = scmp.ne.s32.totalorder %s515_s1, %s340_s30  ;;  %s32_s27 = int_to_ptr.vmem [resolvable:$true] %s31_s27 }
   0x6   :  { %p344_p1 = scmp.lt.u32.totalorder %s340_s30, %s515_s1 }
   0x8   :  { %p346_p2 = pnand %p344_p1, %p341_p0 }
   0xa   :  { %349 = shalt.err (!%p346_p2)
}
   0xb   :  { %s350_s6 = scalar_lea.vmem %s32_s27, 128  ;;  %p355_p4 = scmp.lt.s32.totalorder %s32_s27, %s32_s27 }
   0xc   :  { %p351_p3 = scmp.ne.s32.totalorder %s32_s27, %s350_s6  ;;  %p356_p5 = scmp.lt.s32.totalorder %s350_s6, %s350_s6 }
   0xe   :  { %p357_p6 = por %p356_p5, %p355_p4 }
  0x10   :  { %p358_p7 = pnand %p357_p6, %p351_p3 }
  0x12   :  { %361 = shalt.err (!%p358_p7)
}
  0x13   :  { %s411_s12 = smov 64   ;;  %s412_s13 = smov 4  }
  0x14   :  { %37 = dma.hbm_to_vmem [thread:$0]  %s515_s1, 128, %s32_s27, [#allocation6], %s411_s12, %s411_s12, %s412_s13  }
  0x15   :  { %s413_s16 = smov [#allocation3]   ;;  %s414_s18 = smov [#allocation7]  }
  0x16   :  { %s22_s17 = sshll.u32 %s413_s16, 4  ;;  %s45_s19 = sshll.u32 %s414_s18, 4  ;;  %s23_s17 = int_to_ptr.vmem [resolvable:$true] %s22_s17  ;;  %s46_s19 = int_to_ptr.vmem [resolvable:$true] %s45_s19 }
  0x17   :  { %s362_s22 = scalar_lea.hbm %s514_s0, 128 }
  0x18   :  { %p363_p8 = scmp.ne.s32.totalorder %s514_s0, %s362_s22  ;;  %p366_p9 = scmp.lt.u32.totalorder %s362_s22, %s514_s0 }
  0x1a   :  { %p368_p10 = pnand %p366_p9, %p363_p8 }
  0x1c   :  { %371 = shalt.err (!%p368_p10)
}
  0x1d   :  { %s372_s1 = scalar_lea.vmem %s23_s17, 128  ;;  %p377_p12 = scmp.lt.s32.totalorder %s23_s17, %s23_s17 }
  0x1e   :  { %p373_p11 = scmp.ne.s32.totalorder %s23_s17, %s372_s1  ;;  %p378_p13 = scmp.lt.s32.totalorder %s372_s1, %s372_s1 }
  0x20   :  { %p379_p0 = por %p378_p13, %p377_p12 }
  0x22   :  { %p380_p1 = pnand %p379_p0, %p373_p11 }
  0x24   :  { %383 = shalt.err (!%p380_p1)
}
  0x25   :  { %25 = dma.hbm_to_vmem [thread:$0]  %s514_s0, 128, %s23_s17, [#allocation4]  }
  0x26   :  { %s384_s8 = scalar_lea.hbm %s517_s3, 1024 }
  0x27   :  { %p385_p2 = scmp.ne.s32.totalorder %s517_s3, %s384_s8  ;;  %p388_p3 = scmp.lt.u32.totalorder %s384_s8, %s517_s3 }
  0x29   :  { %p390_p4 = pnand %p388_p3, %p385_p2 }
  0x2b   :  { %393 = shalt.err (!%p390_p4)
}
  0x2c   :  { %s394_s14 = scalar_lea.vmem %s46_s19, 1024  ;;  %p399_p6 = scmp.lt.s32.totalorder %s46_s19, %s46_s19 }
  0x2d   :  { %p395_p5 = scmp.ne.s32.totalorder %s46_s19, %s394_s14  ;;  %p400_p7 = scmp.lt.s32.totalorder %s394_s14, %s394_s14 }
  0x2f   :  { %p401_p8 = por %p400_p7, %p399_p6 }
  0x31   :  { %p402_p9 = pnand %p401_p8, %p395_p5 }
  0x33   :  { %405 = shalt.err (!%p402_p9)
}
  0x34   :  { %51 = dma.hbm_to_vmem [thread:$0]  %s517_s3, 1024, %s46_s19, [#allocation6], %s411_s12, %s411_s12, %s412_s13  }
  0x35   :  { %406 = dma.done.wait [#allocation4], 128  }
  0x36   :  { %407 = vsyncadd [#allocation4], 4294967168 }
  0x37   :  { %408 = dma.done.wait [#allocation6], 1152  }
  0x38   :  { %409 = vsyncadd [#allocation6], 4294966144  ;;  %v415_v1 = vmov 0.0   ;;  %vm416_vm0 = vmmov 0   ;;  %v327_v2 = vld [vmem:[#allocation5] sm:$0xff]   ;;  %v68_v3 = vld [vmem:[#allocation3] sm:$0xff] }
  0x39   :  { %294 = vmatprep.subr.bf16.mxu0 %v415_v1  ;;  %296 = vmatprep.mubr.msk.bf16.mxu0 %vm416_vm0, %v415_v1  ;;  %v69_v4 = vpack.c.bf16 %v68_v3, %v68_v3  ;;  %vm85_vm1 = vcmask 130048   ;;  %v328_v5 = vld [vmem:[#allocation7] sm:$0xff]   ;;  %v329_v6 = vld [vmem:[#allocation7 + $0x8] sm:$0xff]   ;;  %v330_v7 = vld [vmem:[#allocation7 + $0x10] sm:$0xff]   ;;  %vm261_vm2 = vcmask 7168  }
  0x3a   :  { %300 = vmatprep.subr.bf16.mxu1 %v415_v1  ;;  %316 = vmatprep.mubr.msk.bf16.mxu1 %vm416_vm0, %v415_v1  ;;  %v331_v8 = vld [vmem:[#allocation7 + $0x18] sm:$0xff]   ;;  %v332_v9 = vld [vmem:[#allocation7 + $0x20] sm:$0xff]   ;;  %v333_v10 = vld [vmem:[#allocation7 + $0x28] sm:$0xff]  }
  0x3b   :  { %295 = vmatpush3.bf16.msra.mxu0 %v327_v2  ;;  %301 = vmatpush3.bf16.msra.mxu1 %v328_v5  ;;  %v334_v11 = vld [vmem:[#allocation7 + $0x30] sm:$0xff]   ;;  %v335_v12 = vld [vmem:[#allocation7 + $0x38] sm:$0xff]   ;;  %v269_v13 = vld [vmem:[%s516_s2] ss:$0 sm:$0xff] }
  0x3c   :  { %302 = vmatprep.subr.bf16.mxu1 %v415_v1  ;;  %v272_v21 = vld [vmem:[%s518_s4] ss:$0 sm:$0xff] }
  0x3d   :  { %v281_v27 = vld [vmem:[%s519_s5] ss:$0 sm:$0xff] }
  0x3e   :  { %297 = vmatmul.mubr.msk.bf16.vlgmr.msra.gmra.mrb[0].mxu0 %vm85_vm1, %v69_v4  ;;  %v282_v30 = vld [vmem:[#allocation2] ss:$0 sm:$0xff] }
  0x3f   :  { %303 = vmatpush3.bf16.msra.mxu1 %v329_v6 }
  0x40   :  { %304 = vmatprep.subr.bf16.mxu1 %v415_v1 }
  0x43   :  { %305 = vmatpush3.bf16.msra.mxu1 %v330_v7 }
  0x44   :  { %306 = vmatprep.subr.bf16.mxu1 %v415_v1 }
  0x47   :  { %307 = vmatpush3.bf16.msra.mxu1 %v331_v8 }
  0x48   :  { %308 = vmatprep.subr.bf16.mxu1 %v415_v1 }
  0x4b   :  { %309 = vmatpush3.bf16.msra.mxu1 %v332_v9 }
  0x4c   :  { %310 = vmatprep.subr.bf16.mxu1 %v415_v1 }
  0x4f   :  { %311 = vmatpush3.bf16.msra.mxu1 %v333_v10 }
  0x50   :  { %312 = vmatprep.subr.bf16.mxu1 %v415_v1 }
  0x53   :  { %313 = vmatpush3.bf16.msra.mxu1 %v334_v11 }
  0x54   :  { %314 = vmatprep.subr.bf16.mxu1 %v415_v1 }
  0x57   :  { %315 = vmatpush3.bf16.msra.mxu1 %v335_v12 }
 0x111   :  { %v123_v14 = vpop.f32.mrb[0].mxu0 }
 0x112   :  { %v124_v15 = vadd.f32 %v269_v13, %v123_v14  ;;  %v298_v16 = vpop.f32.mrb[1].mxu0 }
 0x113   :  { %v126_v17 = vpop.f32.mrb[2].mxu0 }
 0x114   :  { %336 = vtanh.f32 %v124_v15  ;;  %v299_v18 = vpop.f32.mrb[3].mxu0 }
 0x11e   :  { %v337_v19 = vpop.eup %336 }
 0x11f   :  { %v130_v20 = vpack.c.bf16 %v337_v19, %v337_v19 }
 0x121   :  { %317 = vmatmul.mubr.bf16.vlgmr.msra.gmra.mrb[0].mxu1 %v130_v20 }
 0x1f4   :  { %v236_v22 = vpop.f32.mrb[0].mxu1 }
 0x1f5   :  { %v237_v23 = vadd.f32 %v272_v21, %v236_v22  ;;  %v318_v24 = vpop.f32.mrb[1].mxu1 }
 0x1f6   :  { %v239_v25 = vpop.f32.mrb[2].mxu1 }
 0x1f7   :  { %338 = vtanh.f32 %v237_v23  ;;  %v319_v26 = vpop.f32.mrb[3].mxu1 }
 0x201   :  { %v339_v28 = vpop.eup %338 }
 0x202   :  { %v250_v29 = vmul.f32 %v339_v28, %v281_v27 }
 0x204   :  { %251 = vadd.xlane.f32.xlu0 %v250_v29 }
 0x291   :  { %v252_v31 = vpop.xlane.xlu0 %251 }
 0x292   :  { %v260_v32 = vadd.f32 %v282_v30, %v252_v31 }
 0x294   :  { %262 = vst.msk [vmem:[%s521_s7] sm:$0xff] %vm261_vm2, %v260_v32 }
 0x295   :  { %267 = vsyncpa [#allocation4], 1 }
 0x296   :  { %268 = vsyncpa [#allocation6], 1 }

</bundles_post_ra>
